<compile_context>
chip_gen: v6e
topology: v6e:2x2x1
jax: 0.10.0
libtpu: 0.0.40
codegen_flags: <defaults>
</compile_context>

<pallas_src>
import functools

import numpy as np
import jax
import jax.numpy as jnp
from jax.experimental import pallas as pl
from jax.experimental.pallas import tpu as pltpu

BN_EPS = 1e-5
CP = 128  # channel padding (lane width) -> lane-dense stores everywhere
_TAPS = [(di, dj) for di in (-1, 0, 1) for dj in (-1, 0, 1)]


# ----------------------------- kernel helpers ------------------------------ #
def _bn_train(y, gamma, beta, eps):
    """Training-mode BatchNorm over the M (row) axis, f32 throughout."""
    mean = jnp.mean(y, axis=0, keepdims=True)
    var = jnp.mean(jnp.square(y - mean), axis=0, keepdims=True)
    return (y - mean) * jax.lax.rsqrt(var + eps) * gamma + beta


def _conv3x3_from_scratch(src_ref, w_ref, mask_ref, *, m, ow, pad_top):
    """3x3 stride-1 'same' conv on a flattened (M, CP) image held in a
    zero-padded VMEM scratch.  Decomposed into 9 shifted (M,CP)@(CP,CP) bf16
    matmuls accumulated in f32; mask_ref (M, 9) zeroes rows whose flattened
    shift wrapped across an image-row / batch-image boundary."""
    acc = jnp.zeros((m, CP), jnp.float32)
    for t, (di, dj) in enumerate(_TAPS):
        off = pad_top + di * ow + dj                      # static python int
        win = src_ref[off:off + m, :] * mask_ref[:, t:t + 1]
        acc = acc + jnp.dot(win.astype(jnp.bfloat16),
                            w_ref[t * CP:(t + 1) * CP, :],
                            preferred_element_type=jnp.float32)
    return acc


# ------------------------------- kernels ----------------------------------- #
def _stem_kernel(p_ref, w_ref, bn_ref, o_ref, *, eps):
    """conv7x7 (im2col matmul) + BN + ReLU; lane-dense (M, 128) output."""
    y = jnp.dot(p_ref[...].astype(jnp.bfloat16), w_ref[...],
                preferred_element_type=jnp.float32)
    y = _bn_train(y, bn_ref[0:1, :], bn_ref[1:2, :], eps)
    o_ref[...] = jnp.maximum(y, 0.0).astype(o_ref.dtype)   # dropout(p=0) elided


def _block_ds_kernel(p1_ref, w1_ref, w2_ref, pds_ref, wds_ref, bn_ref, mask_ref,
                     o_ref, hpad_ref, *, m, ow, pad_top, eps):
    """Fused stride-2 BasicBlock: conv1+BN1+ReLU -> conv2+BN2, plus the fused
    1x1-downsample+BNds shortcut, residual add and final ReLU."""
    # conv1 (im2col patches built in wrapper, stride 2) + BN1 + ReLU
    h = jnp.dot(p1_ref[...].astype(jnp.bfloat16), w1_ref[...],
                preferred_element_type=jnp.float32)
    h = jnp.maximum(_bn_train(h, bn_ref[0:1, :], bn_ref[1:2, :], eps), 0.0)
    # keep h in VMEM: stash into zero-padded scratch for the in-kernel 3x3 gather
    hpad_ref[...] = jnp.zeros_like(hpad_ref)
    hpad_ref[pad_top:pad_top + m, :] = h
    # conv2 + BN2 (in-kernel gather; h never touches HBM)
    y = _conv3x3_from_scratch(hpad_ref, w2_ref, mask_ref,
                              m=m, ow=ow, pad_top=pad_top)
    y = _bn_train(y, bn_ref[2:3, :], bn_ref[3:4, :], eps)
    # 1x1 stride-2 downsample + BNds (fused shortcut, no HBM round trip)
    sc = jnp.dot(pds_ref[...].astype(jnp.bfloat16), wds_ref[...],
                 preferred_element_type=jnp.float32)
    sc = _bn_train(sc, bn_ref[4:5, :], bn_ref[5:6, :], eps)
    o_ref[...] = jnp.maximum(y + sc, 0.0).astype(o_ref.dtype)


def _block_id_kernel(x_ref, w1_ref, w2_ref, bn_ref, mask_ref,
                     o_ref, xpad_ref, hpad_ref, *, m, ow, pad_top, eps):
    """Fused stride-1 BasicBlock with identity shortcut; both 3x3 convs are
    gathered in-kernel, so no im2col patches are materialized at all."""
    xpad_ref[...] = jnp.zeros_like(xpad_ref)
    xpad_ref[pad_top:pad_top + m, :] = x_ref[...]
    h = _conv3x3_from_scratch(xpad_ref, w1_ref, mask_ref,
                              m=m, ow=ow, pad_top=pad_top)
    h = jnp.maximum(_bn_train(h, bn_ref[0:1, :], bn_ref[1:2, :], eps), 0.0)
    hpad_ref[...] = jnp.zeros_like(hpad_ref)
    hpad_ref[pad_top:pad_top + m, :] = h
    y = _conv3x3_from_scratch(hpad_ref, w2_ref, mask_ref,
                              m=m, ow=ow, pad_top=pad_top)
    y = _bn_train(y, bn_ref[2:3, :], bn_ref[3:4, :], eps)
    o_ref[...] = jnp.maximum(y + x_ref[...], 0.0).astype(o_ref.dtype)


def _call_fused(kernel, inputs, m, scratch_shapes):
    """Single-step pallas_call with full-array VMEM blocks (all operands are
    tiny); output is lane-dense (M, 128)."""
    in_specs = [pl.BlockSpec(x.shape, lambda i: (0, 0)) for x in inputs]
    return pl.pallas_call(
        kernel,
        grid=(1,),
        in_specs=in_specs,
        out_specs=pl.BlockSpec((m, CP), lambda i: (0, 0)),
        out_shape=jax.ShapeDtypeStruct((m, CP), jnp.float32),
        scratch_shapes=scratch_shapes,
        compiler_params=pltpu.CompilerParams(
            dimension_semantics=("arbitrary",)),
    )(*inputs)


# ------------------------------- JAX glue ----------------------------------- #
def _round_up(x, mult):
    return (x + mult - 1) // mult * mult


def _im2col(x, kh, kw, stride, pad, kpad):
    """x: (N,H,W,C) -> (N*OH*OW, kpad); K index order = (i, j, c), zero-padded."""
    n, h, w, c = x.shape
    if pad:
        x = jnp.pad(x, ((0, 0), (pad, pad), (pad, pad), (0, 0)))
    oh = (h + 2 * pad - kh) // stride + 1
    ow = (w + 2 * pad - kw) // stride + 1
    cols = []
    for i in range(kh):
        for j in range(kw):
            cols.append(x[:, i:i + stride * oh:stride, j:j + stride * ow:stride, :])
    p = jnp.concatenate(cols, axis=-1).reshape(n * oh * ow, kh * kw * c)
    if kpad > kh * kw * c:
        p = jnp.pad(p, ((0, 0), (0, kpad - kh * kw * c)))
    return p, oh, ow


def _conv3x3_masks(n, oh, ow):
    """(M, 9) f32 validity masks for the in-kernel flattened-shift 3x3 gather."""
    m = n * oh * ow
    idx = np.arange(m)
    xx = idx % ow
    yy = (idx // ow) % oh
    cols = []
    for di, dj in _TAPS:
        ok = np.ones(m, bool)
        if di == -1:
            ok &= yy > 0
        if di == 1:
            ok &= yy < oh - 1
        if dj == -1:
            ok &= xx > 0
        if dj == 1:
            ok &= xx < ow - 1
        cols.append(ok)
    return jnp.asarray(np.stack(cols, axis=1).astype(np.float32))


def _he(key, cout, cin, kh, kw):
    fan_in = cin * kh * kw
    return jax.random.normal(key, (cout, cin, kh, kw), jnp.float32) * jnp.sqrt(2.0 / fan_in)


def _im2col_weight(key, cout, cin, kh, kw):
    """PyTorch (cout,cin,kh,kw) -> (Kpad, 128) bf16 matmul weight, K order (i,j,c)."""
    k = kh * kw * cin
    kpad = _round_up(k, 128)
    w = _he(key, cout, cin, kh, kw)
    wm = jnp.transpose(w, (2, 3, 1, 0)).reshape(k, cout)
    out = jnp.zeros((kpad, CP), jnp.float32).at[:k, :cout].set(wm)
    return out.astype(jnp.bfloat16), kpad


def _tap_weight(key, cout, cin):
    """3x3 weight split into 9 (128,128) tap chunks stacked to (9*128, 128) bf16."""
    w = _he(key, cout, cin, 3, 3)
    chunks = []
    for ki in range(3):
        for kj in range(3):
            c = jnp.zeros((CP, CP), jnp.float32).at[:cin, :cout].set(w[:, :, ki, kj].T)
            chunks.append(c)
    return jnp.concatenate(chunks, axis=0).astype(jnp.bfloat16)


def _bn_params(key, c, scenario_num):
    kg, kb = jax.random.split(key)
    gamma = 1.0 + 0.1 * jax.random.normal(kg, (scenario_num, c), jnp.float32)
    beta = 0.1 * jax.random.normal(kb, (scenario_num, c), jnp.float32)
    # channel-pad to 128 lanes so per-call BN params pack into one (rows,128) operand
    return jnp.pad(gamma, ((0, 0), (0, CP - c))), jnp.pad(beta, ((0, 0), (0, CP - c)))


def init_encoder_params(key, planes=16, layer_sizes=(2, 1), scenario_num=2,
                        first_kernel_size=7):
    keys = iter(jax.random.split(key, 256))
    w1, kpad = _im2col_weight(next(keys), planes, 3, first_kernel_size, first_kernel_size)
    params = {"conv1_w": w1, "conv1_kpad": kpad, "planes": planes,
              "first_kernel_size": first_kernel_size}
    params["ln1_g"], params["ln1_b"] = _bn_params(next(keys), planes, scenario_num)

    in_planes = planes
    layers = []
    for layer_size in layer_sizes:
        out_planes = in_planes * 2
        blocks = []
        for b in range(layer_size):
            stride = 2 if b == 0 else 1
            cin = in_planes if b == 0 else out_planes
            blk = {"stride": stride, "cin": cin, "cout": out_planes}
            if stride == 1:
                blk["conv1_w"] = _tap_weight(next(keys), out_planes, cin)
            else:
                blk["conv1_w"], blk["conv1_kpad"] = _im2col_weight(
                    next(keys), out_planes, cin, 3, 3)
            blk["bn1_g"], blk["bn1_b"] = _bn_params(next(keys), out_planes, scenario_num)
            blk["conv2_w"] = _tap_weight(next(keys), out_planes, out_planes)
            blk["bn2_g"], blk["bn2_b"] = _bn_params(next(keys), out_planes, scenario_num)
            if stride != 1 or cin != out_planes:
                wds = _he(next(keys), out_planes, cin, 1, 1)[:, :, 0, 0]   # (cout, cin)
                blk["ds_w"] = jnp.zeros((CP, CP), jnp.float32).at[
                    :cin, :out_planes].set(wds.T).astype(jnp.bfloat16)
                blk["bnds_g"], blk["bnds_b"] = _bn_params(next(keys), out_planes, scenario_num)
            else:
                blk["ds_w"] = None
            blocks.append(blk)
        layers.append(blocks)
        in_planes = out_planes
    params["layers"] = layers
    return params


def _basic_block(x_flat, spatial, blk, scenario):
    """x_flat: (N*H*W, 128) channel-padded activations; spatial = (N, H, W)."""
    n, h, w = spatial
    stride = blk["stride"]
    cin = blk["cin"]
    oh = (h + 2 - 3) // stride + 1
    ow = (w + 2 - 3) // stride + 1
    m = n * oh * ow
    pad_top = _round_up(ow + 1, 8)
    scratch_rows = _round_up(pad_top + m + ow + 1, 8)
    mask = _conv3x3_masks(n, oh, ow)
    bn_rows = [blk["bn1_g"][scenario], blk["bn1_b"][scenario],
               blk["bn2_g"][scenario], blk["bn2_b"][scenario]]

    if blk["ds_w"] is not None:
        # stride-2 block: conv1 patches + 1x1 shortcut patches built in the wrapper
        x4p = x_flat.reshape(n, h, w, CP)
        p1, _, _ = _im2col(x4p[..., :cin], 3, 3, stride, 1, blk["conv1_kpad"])
        pds = x4p[:, ::stride, ::stride, :].reshape(m, CP)
        bn_rows += [blk["bnds_g"][scenario], blk["bnds_b"][scenario]]
        bn = jnp.stack(bn_rows, axis=0)
        kernel = functools.partial(_block_ds_kernel, m=m, ow=ow,
                                   pad_top=pad_top, eps=BN_EPS)
        inputs = [p1, blk["conv1_w"], blk["conv2_w"], pds, blk["ds_w"], bn, mask]
        scratch = [pltpu.VMEM((scratch_rows, CP), jnp.float32)]
    else:
        # stride-1 block: everything (both convs, shortcut) stays in VMEM
        bn = jnp.stack(bn_rows, axis=0)
        kernel = functools.partial(_block_id_kernel, m=m, ow=ow,
                                   pad_top=pad_top, eps=BN_EPS)
        inputs = [x_flat, blk["conv1_w"], blk["conv2_w"], bn, mask]
        scratch = [pltpu.VMEM((scratch_rows, CP), jnp.float32),
                   pltpu.VMEM((scratch_rows, CP), jnp.float32)]

    out = _call_fused(kernel, inputs, m, scratch)
    return out, (n, oh, ow)


def encoder_forward(params, x_nchw, scenario):
    """x_nchw: (N, 3, H, W); scenario: static python int (ModuleList index)."""
    fk = params["first_kernel_size"]
    x = jnp.transpose(x_nchw, (0, 2, 3, 1)).astype(jnp.float32)   # -> NHWC
    n = x.shape[0]

    # stem: conv7x7 s2 -> BN[scenario] -> (dropout p=0) -> ReLU, fused.
    p, oh, ow = _im2col(x, fk, fk, 2, fk // 2, params["conv1_kpad"])
    bn = jnp.stack([params["ln1_g"][scenario], params["ln1_b"][scenario]], axis=0)
    m = n * oh * ow
    x_flat = _call_fused(functools.partial(_stem_kernel, eps=BN_EPS),
                         [p, params["conv1_w"], bn], m, [])
    spatial = (n, oh, ow)

    cout = params["planes"]
    for layer in params["layers"]:
        for blk in layer:
            x_flat, spatial = _basic_block(x_flat, spatial, blk, scenario)
            cout = blk["cout"]

    n, oh, ow = spatial
    out = x_flat[:, :cout].reshape(n, oh, ow, cout)
    return jnp.transpose(out, (0, 3, 1, 2))   # back to NCHW like PyTorch


# --------------------------------- main ------------------------------------- #
if __name__ == "__main__":
    key = jax.random.PRNGKey(0)
    pkey, xkey = jax.random.split(key)

    planes = 16
    layer_sizes = (2, 1)          # out_planes = 16 * 2**2 = 64
    scenario_num = 2

    params = init_encoder_params(pkey, planes=planes, layer_sizes=layer_sizes,
                                 scenario_num=scenario_num, first_kernel_size=7)
    x = jax.random.normal(xkey, (2, 3, 16, 16), jnp.float32)   # NCHW, like PyTorch

    out = encoder_forward(params, x, scenario=1)
    out = jax.block_until_ready(out)

    # 16x16 -> /2 (stem) -> /2 (layer1) -> /2 (layer2) = 2x2, channels 64
    assert out.shape == (2, planes * 2 ** len(layer_sizes), 2, 2), out.shape
    assert bool(jnp.all(jnp.isfinite(out)))
    print("KERNEL_OK")
</pallas_src>

<mosaic_0001>
module attributes {stable_mosaic.version = 11 : i64} {
  func.func @_stem_kernel(%arg0: i32, %arg1: memref<128x256xf32, #tpu.memory_space<vmem>>, %arg2: memref<256x128xbf16, #tpu.memory_space<vmem>>, %arg3: memref<2x128xf32, #tpu.memory_space<vmem>>, %arg4: memref<128x128xf32, #tpu.memory_space<vmem>>) attributes {dimension_semantics = [#tpu.dimension_semantics<arbitrary>], iteration_bounds = array<i64: 1>, scalar_prefetch = 0 : i64, scratch_operands = 0 : i64, tpu.core_type = #tpu.core_type<tc>, window_params = [{pipeline_mode = #tpu.pipeline_mode<synchronous>, transform_indices = @transform_0, window_bounds = array<i64: 128, 256>}, {pipeline_mode = #tpu.pipeline_mode<synchronous>, transform_indices = @transform_1, window_bounds = array<i64: 256, 128>}, {pipeline_mode = #tpu.pipeline_mode<synchronous>, transform_indices = @transform_2, window_bounds = array<i64: 2, 128>}, {pipeline_mode = #tpu.pipeline_mode<synchronous>, transform_indices = @transform_3, window_bounds = array<i64: 128, 128>}]} {
    %c0 = arith.constant 0 : index
    %c0_0 = arith.constant 0 : index
    %0 = vector.load %arg1[%c0, %c0_0] : memref<128x256xf32, #tpu.memory_space<vmem>>, vector<128x256xf32>
    %1 = arith.truncf %0 : vector<128x256xf32> to vector<128x256xbf16>
    %c0_1 = arith.constant 0 : index
    %c0_2 = arith.constant 0 : index
    %2 = vector.load %arg2[%c0_1, %c0_2] : memref<256x128xbf16, #tpu.memory_space<vmem>>, vector<256x128xbf16>
    %cst = arith.constant dense<0.000000e+00> : vector<128x128xf32>
    %3 = tpu.matmul %1, %2, %cst {dimension_numbers = #tpu.dot_dimension_numbers<[1], [0], [0], [1], [0, 0, 1, 1], [], []>} : vector<128x256xbf16>, vector<256x128xbf16>, vector<128x128xf32> -> vector<128x128xf32>
    %c0_3 = arith.constant 0 : index
    %c0_4 = arith.constant 0 : index
    %4 = vector.load %arg3[%c0_3, %c0_4] : memref<2x128xf32, #tpu.memory_space<vmem>>, vector<1x128xf32>
    %c1 = arith.constant 1 : index
    %c0_5 = arith.constant 0 : index
    %5 = vector.load %arg3[%c1, %c0_5] : memref<2x128xf32, #tpu.memory_space<vmem>>, vector<1x128xf32>
    %cst_6 = arith.constant dense<0.000000e+00> : vector<128xf32>
    %6 = vector.multi_reduction <add>, %3, %cst_6 [0] : vector<128x128xf32> to vector<128xf32>
    %7 = vector.shape_cast %6 : vector<128xf32> to vector<1x128xf32>
    %cst_7 = arith.constant 1.280000e+02 : f32
    %8 = vector.broadcast %cst_7 : f32 to vector<1x128xf32>
    %9 = arith.divf %7, %8 : vector<1x128xf32>
    %10 = vector.broadcast %9 : vector<1x128xf32> to vector<128x128xf32>
    %11 = arith.subf %3, %10 : vector<128x128xf32>
    %12 = arith.mulf %11, %11 : vector<128x128xf32>
    %cst_8 = arith.constant dense<0.000000e+00> : vector<128xf32>
    %13 = vector.multi_reduction <add>, %12, %cst_8 [0] : vector<128x128xf32> to vector<128xf32>
    %14 = vector.shape_cast %13 : vector<128xf32> to vector<1x128xf32>
    %cst_9 = arith.constant 1.280000e+02 : f32
    %15 = vector.broadcast %cst_9 : f32 to vector<1x128xf32>
    %16 = arith.divf %14, %15 : vector<1x128xf32>
    %17 = vector.broadcast %9 : vector<1x128xf32> to vector<128x128xf32>
    %18 = arith.subf %3, %17 : vector<128x128xf32>
    %cst_10 = arith.constant 9.99999974E-6 : f32
    %19 = vector.broadcast %cst_10 : f32 to vector<1x128xf32>
    %20 = arith.addf %16, %19 : vector<1x128xf32>
    %21 = math.rsqrt %20 : vector<1x128xf32>
    %22 = vector.broadcast %21 : vector<1x128xf32> to vector<128x128xf32>
    %23 = arith.mulf %18, %22 : vector<128x128xf32>
    %24 = vector.broadcast %4 : vector<1x128xf32> to vector<128x128xf32>
    %25 = arith.mulf %23, %24 : vector<128x128xf32>
    %26 = vector.broadcast %5 : vector<1x128xf32> to vector<128x128xf32>
    %27 = arith.addf %25, %26 : vector<128x128xf32>
    %cst_11 = arith.constant 0.000000e+00 : f32
    %28 = vector.broadcast %cst_11 : f32 to vector<128x128xf32>
    %29 = arith.maximumf %27, %28 : vector<128x128xf32>
    %c0_12 = arith.constant 0 : index
    %c0_13 = arith.constant 0 : index
    %30 = vector.load %arg4[%c0_12, %c0_13] : memref<128x128xf32, #tpu.memory_space<vmem>>, vector<128x128xf32>
    tpu.vector_store %arg4[%c0_12, %c0_13], %29 {strides = array<i32>} : memref<128x128xf32, #tpu.memory_space<vmem>>, vector<128x128xf32>,
    return
  }
  func.func @transform_0(%arg0: i32) -> (i32, i32) {
    %c0_i32 = arith.constant 0 : i32
    %c0_i32_0 = arith.constant 0 : i32
    %c0_i32_1 = arith.constant 0 : i32
    return %c0_i32, %c0_i32_0 : i32, i32
  }
  func.func @transform_1(%arg0: i32) -> (i32, i32) {
    %c0_i32 = arith.constant 0 : i32
    %c0_i32_0 = arith.constant 0 : i32
    %c0_i32_1 = arith.constant 0 : i32
    return %c0_i32, %c0_i32_0 : i32, i32
  }
  func.func @transform_2(%arg0: i32) -> (i32, i32) {
    %c0_i32 = arith.constant 0 : i32
    %c0_i32_0 = arith.constant 0 : i32
    %c0_i32_1 = arith.constant 0 : i32
    return %c0_i32, %c0_i32_0 : i32, i32
  }
  func.func @transform_3(%arg0: i32) -> (i32, i32) {
    %c0_i32 = arith.constant 0 : i32
    %c0_i32_0 = arith.constant 0 : i32
    %c0_i32_1 = arith.constant 0 : i32
    return %c0_i32, %c0_i32_0 : i32, i32
  }
}

</mosaic_0001>

<bundles_post_ra>
// kernel: tpu_custom_call.1
= control target key start
LH: loop header
LB: loop body
LE: loop exit
PB: predicated region body
PF: predicated region fallthrough
CT: control target
= control target key end

     0   :  { %8 = vsyncpa [#allocation3], 0  ;;  %s746_s0 = inlined_call_operand.hbm [shape: f32[128,256], index: 0, kind: input, shape index: {}]   ;;  %s747_s1 = inlined_call_operand.hbm [shape: bf16[256,128], index: 1, kind: input, shape index: {}]   ;;  %s748_s2 = inlined_call_operand.vmem [shape: f32[2,128], index: 2, kind: input, shape index: {}]   ;;  %s749_s3 = inlined_call_operand.hbm [shape: f32[128,128], index: 3, kind: output, shape index: {}]  }
   0x1   :  { %9 = vsyncpa [#allocation6], 0 }
   0x2   :  { %10 = vsyncpa [#allocation4], 0  ;;  %s695_s12 = smov [#allocation2]  }
   0x3   :  { %s16_s13 = sshll.u32 %s695_s12, 4  ;;  %s17_s13 = int_to_ptr.vmem [resolvable:$true] %s16_s13 }
   0x4   :  { %s637_s14 = scalar_lea.vmem %s17_s13, 4096  ;;  %p642_p1 = scmp.lt.s32.totalorder %s17_s13, %s17_s13 }
   0x5   :  { %p638_p0 = scmp.ne.s32.totalorder %s17_s13, %s637_s14  ;;  %p643_p2 = scmp.lt.s32.totalorder %s637_s14, %s637_s14 }
   0x7   :  { %p644_p3 = por %p643_p2, %p642_p1 }
   0x9   :  { %p645_p4 = pnand %p644_p3, %p638_p0 }
   0xb   :  { %648 = shalt.err (!%p645_p4)
}
   0xc   :  { %s696_s15 = smov 256   ;;  %s697_s16 = smov 16  }
   0xd   :  { %22 = dma.hbm_to_vmem [thread:$0]  %s746_s0, 4096, %s17_s13, [#allocation3], %s696_s15, %s696_s15, %s697_s16  }
   0xe   :  { %s698_s19 = smov [#allocation5]  }
   0xf   :  { %s28_s20 = sshll.u32 %s698_s19, 4  ;;  %s29_s20 = int_to_ptr.vmem [resolvable:$true] %s28_s20 }
  0x10   :  { %s657_s21 = scalar_lea.vmem %s29_s20, 2048  ;;  %p662_p6 = scmp.lt.s32.totalorder %s29_s20, %s29_s20 }
  0x11   :  { %p658_p5 = scmp.ne.s32.totalorder %s29_s20, %s657_s21  ;;  %p663_p7 = scmp.lt.s32.totalorder %s657_s21, %s657_s21 }
  0x13   :  { %p664_p8 = por %p663_p7, %p662_p6 }
  0x15   :  { %p665_p9 = pnand %p664_p8, %p658_p5 }
  0x17   :  { %668 = shalt.err (!%p665_p9)
}
  0x18   :  { %s699_s22 = smov 64   ;;  %s700_s23 = smov 4  }
  0x19   :  { %34 = dma.hbm_to_vmem [thread:$0]  %s747_s1, 2048, %s29_s20, [#allocation6], %s699_s22, %s699_s22, %s700_s23  }
  0x1a   :  { %689 = dma.done.wait [#allocation3], 4096  }
  0x1b   :  { %690 = vsyncadd [#allocation3], 4294963200 }
  0x1c   :  { %691 = dma.done.wait [#allocation6], 2048  }
  0x1d   :  { %692 = vsyncadd [#allocation6], 4294965248  ;;  %v611_v0 = vld [vmem:[#allocation5 + $0x78] sm:$0xff]   ;;  %v613_v2 = vld [vmem:[#allocation5 + $0x70] sm:$0xff]  }
  0x1e   :  { %v612_v1 = vld [vmem:[#allocation5 + $0x38] sm:$0xff]   ;;  %522 = vmatprep.subr.bf16.mxu0 %v611_v0  ;;  %586 = vmatprep.subr.bf16.mxu1 %v611_v0  ;;  %v614_v3 = vld [vmem:[#allocation5 + $0x30] sm:$0xff]   ;;  %v615_v4 = vld [vmem:[#allocation5 + $0x68] sm:$0xff]  }
  0x1f   :  { %523 = vmatpush3.bf16.msra.mxu0 %v612_v1  ;;  %594 = vmatpush3.bf16.msra.mxu1 %v612_v1  ;;  %v616_v5 = vld [vmem:[#allocation5 + $0x28] sm:$0xff]   ;;  %v617_v6 = vld [vmem:[#allocation5 + $0x60] sm:$0xff]   ;;  %v619_v8 = vld [vmem:[#allocation5 + $0x58] sm:$0xff]  }
  0x20   :  { %524 = vmatprep.subr.bf16.mxu0 %v613_v2  ;;  %587 = vmatprep.subr.bf16.mxu1 %v613_v2  ;;  %v618_v7 = vld [vmem:[#allocation5 + $0x20] sm:$0xff]   ;;  %v620_v9 = vld [vmem:[#allocation5 + $0x18] sm:$0xff]   ;;  %v621_v10 = vld [vmem:[#allocation5 + $0x50] sm:$0xff]  }
  0x21   :  { %v45_v11 = vld [vmem:[#allocation2 + $0x8] sm:$0xff]  ;;  %v47_v12 = vld [vmem:[#allocation2 + $0x18] sm:$0xff]  ;;  %v622_v15 = vld [vmem:[#allocation5 + $0x10] sm:$0xff]  }
  0x22   :  { %v77_v13 = vpack.c.bf16 %v47_v12, %v45_v11  ;;  %v61_v14 = vld [vmem:[#allocation2 + $0x88] sm:$0xff]  ;;  %v63_v16 = vld [vmem:[#allocation2 + $0x98] sm:$0xff]  ;;  %v625_v20 = vld [vmem:[#allocation5 + $0x40] sm:$0xff]  }
  0x23   :  { %525 = vmatpush3.bf16.msra.mxu0 %v614_v3  ;;  %595 = vmatpush3.bf16.msra.mxu1 %v614_v3  ;;  %v623_v17 = vld [vmem:[#allocation5 + $0x48] sm:$0xff]   ;;  %v85_v18 = vpack.c.bf16 %v63_v16, %v61_v14  ;;  %v626_v21 = vld [vmem:[#allocation5] sm:$0xff]   ;;  %v46_v23 = vld [vmem:[#allocation2 + $0x10] sm:$0xff] }
  0x24   :  { %526 = vmatprep.subr.bf16.mxu0 %v615_v4  ;;  %588 = vmatprep.subr.bf16.mxu1 %v615_v4  ;;  %v624_v19 = vld [vmem:[#allocation5 + $0x8] sm:$0xff]   ;;  %v44_v22 = vld [vmem:[#allocation2] sm:$0xff]  ;;  %v62_v26 = vld [vmem:[#allocation2 + $0x90] sm:$0xff] }
  0x25   :  { %252 = vmatprep.mubr.bf16.mxu0 %v77_v13  ;;  %284 = vmatprep.mubr.bf16.mxu1 %v85_v18  ;;  %v49_v24 = vld [vmem:[#allocation2 + $0x28] sm:$0xff]  ;;  %v60_v25 = vld [vmem:[#allocation2 + $0x80] sm:$0xff]  ;;  %v51_v27 = vld [vmem:[#allocation2 + $0x38] sm:$0xff]  ;;  %v76_v30 = vpack.c.bf16 %v46_v23, %v44_v22 }
  0x26   :  { %v65_v28 = vld [vmem:[#allocation2 + $0xa8] sm:$0xff]  ;;  %v67_v29 = vld [vmem:[#allocation2 + $0xb8] sm:$0xff]  ;;  %v84_v31 = vpack.c.bf16 %v62_v26, %v60_v25  ;;  %v79_v32 = vpack.c.bf16 %v51_v27, %v49_v24  ;;  %v48_v34 = vld [vmem:[#allocation2 + $0x20] sm:$0xff] }
  0x27   :  { %527 = vmatpush3.bf16.msra.mxu0 %v616_v5  ;;  %596 = vmatpush3.bf16.msra.mxu1 %v616_v5  ;;  %v87_v33 = vpack.c.bf16 %v67_v29, %v65_v28  ;;  %v50_v35 = vld [vmem:[#allocation2 + $0x30] sm:$0xff]  ;;  %v53_v36 = vld [vmem:[#allocation2 + $0x48] sm:$0xff]  ;;  %v64_v37 = vld [vmem:[#allocation2 + $0xa0] sm:$0xff] }
  0x28   :  { %528 = vmatprep.subr.bf16.mxu0 %v617_v6  ;;  %589 = vmatprep.subr.bf16.mxu1 %v617_v6  ;;  %v66_v38 = vld [vmem:[#allocation2 + $0xb0] sm:$0xff]  ;;  %v55_v39 = vld [vmem:[#allocation2 + $0x58] sm:$0xff]  ;;  %v69_v40 = vld [vmem:[#allocation2 + $0xc8] sm:$0xff]  ;;  %v78_v42 = vpack.c.bf16 %v50_v35, %v48_v34 }
  0x29   :  { %v71_v41 = vld [vmem:[#allocation2 + $0xd8] sm:$0xff]  ;;  %v86_v43 = vpack.c.bf16 %v66_v38, %v64_v37  ;;  %v81_v44 = vpack.c.bf16 %v55_v39, %v53_v36  ;;  %v52_v46 = vld [vmem:[#allocation2 + $0x40] sm:$0xff]  ;;  %v54_v47 = vld [vmem:[#allocation2 + $0x50] sm:$0xff] }
  0x2a   :  { %v89_v45 = vpack.c.bf16 %v71_v41, %v69_v40  ;;  %v57_v48 = vld [vmem:[#allocation2 + $0x68] sm:$0xff]  ;;  %v68_v49 = vld [vmem:[#allocation2 + $0xc0] sm:$0xff]  ;;  %v70_v50 = vld [vmem:[#allocation2 + $0xd0] sm:$0xff]  ;;  %v80_v54 = vpack.c.bf16 %v54_v47, %v52_v46 }
  0x2b   :  { %529 = vmatpush3.bf16.msra.mxu0 %v618_v7  ;;  %597 = vmatpush3.bf16.msra.mxu1 %v618_v7  ;;  %v59_v51 = vld [vmem:[#allocation2 + $0x78] sm:$0xff]  ;;  %v73_v52 = vld [vmem:[#allocation2 + $0xe8] sm:$0xff]  ;;  %v88_v55 = vpack.c.bf16 %v70_v50, %v68_v49  ;;  %v56_v58 = vld [vmem:[#allocation2 + $0x60] sm:$0xff] }
  0x2c   :  { %530 = vmatprep.subr.bf16.mxu0 %v619_v8  ;;  %590 = vmatprep.subr.bf16.mxu1 %v619_v8  ;;  %v75_v53 = vld [vmem:[#allocation2 + $0xf8] sm:$0xff]  ;;  %v83_v56 = vpack.c.bf16 %v59_v51, %v57_v48  ;;  %v58_v59 = vld [vmem:[#allocation2 + $0x70] sm:$0xff]  ;;  %v72_v60 = vld [vmem:[#allocation2 + $0xe0] sm:$0xff] }
  0x2d   :  { %v91_v57 = vpack.c.bf16 %v75_v53, %v73_v52  ;;  %v74_v61 = vld [vmem:[#allocation2 + $0xf0] sm:$0xff]  ;;  %v82_v62 = vpack.c.bf16 %v58_v59, %v56_v58 }
  0x2e   :  { %v90_v63 = vpack.c.bf16 %v74_v61, %v72_v60 }
  0x2f   :  { %531 = vmatpush3.bf16.msra.mxu0 %v620_v9  ;;  %598 = vmatpush3.bf16.msra.mxu1 %v620_v9 }
  0x30   :  { %532 = vmatprep.subr.bf16.mxu0 %v621_v10  ;;  %591 = vmatprep.subr.bf16.mxu1 %v621_v10 }
  0x33   :  { %533 = vmatpush3.bf16.msra.mxu0 %v622_v15  ;;  %599 = vmatpush3.bf16.msra.mxu1 %v622_v15 }
  0x34   :  { %534 = vmatprep.subr.bf16.mxu0 %v623_v17  ;;  %592 = vmatprep.subr.bf16.mxu1 %v623_v17 }
  0x37   :  { %535 = vmatpush3.bf16.msra.mxu0 %v624_v19  ;;  %600 = vmatpush3.bf16.msra.mxu1 %v624_v19 }
  0x38   :  { %536 = vmatprep.subr.bf16.mxu0 %v625_v20  ;;  %593 = vmatprep.subr.bf16.mxu1 %v625_v20 }
  0x3b   :  { %537 = vmatpush3.bf16.msra.mxu0 %v626_v21  ;;  %601 = vmatpush3.bf16.msra.mxu1 %v626_v21 }
  0x3e   :  { %253 = vmatmul.mubr.bf16.vlgmr.msra.gmra.mxu0 %v76_v30  ;;  %285 = vmatmul.mubr.bf16.vlgmr.msra.gmra.mxu1 %v84_v31 }
  0x3f   :  { %260 = vmatprep.mubr.bf16.mxu0 %v79_v32  ;;  %292 = vmatprep.mubr.bf16.mxu1 %v87_v33 }
  0x46   :  { %261 = vmatmul.mubr.bf16.gmra.mxu0 %v78_v42  ;;  %293 = vmatmul.mubr.bf16.gmra.mxu1 %v86_v43 }
  0x47   :  { %268 = vmatprep.mubr.bf16.mxu0 %v81_v44  ;;  %300 = vmatprep.mubr.bf16.mxu1 %v89_v45 }
  0x4e   :  { %269 = vmatmul.mubr.bf16.gmra.mxu0 %v80_v54  ;;  %301 = vmatmul.mubr.bf16.gmra.mxu1 %v88_v55 }
  0x4f   :  { %276 = vmatprep.mubr.bf16.mxu0 %v83_v56  ;;  %308 = vmatprep.mubr.bf16.mxu1 %v91_v57 }
  0x56   :  { %277 = vmatmul.mubr.bf16.gmra.mxu0 %v82_v62  ;;  %309 = vmatmul.mubr.bf16.gmra.mxu1 %v90_v63 }
  0xfe   :  { %v538_v0 = vpop.f32.mrf.mxu0  ;;  %v562_v1 = vpop.f32.mrf.mxu1 }
 0x100   :  { %v539_v2 = vpop.f32.mrf.mxu0  ;;  %v563_v3 = vpop.f32.mrf.mxu1 }
 0x101   :  { %v540_v20 = vadd.f32 %v539_v2, %v538_v0  ;;  %v564_v43 = vadd.f32 %v563_v3, %v562_v1 }
 0x102   :  { %v541_v4 = vpop.f32.mrf.mxu0  ;;  %v565_v5 = vpop.f32.mrf.mxu1 }
 0x104   :  { %v542_v6 = vpop.f32.mrf.mxu0  ;;  %v566_v7 = vpop.f32.mrf.mxu1 }
 0x105   :  { %v543_v18 = vadd.f32 %v542_v6, %v541_v4  ;;  %v567_v45 = vadd.f32 %v566_v7, %v565_v5 }
 0x106   :  { %v544_v8 = vpop.f32.mrf.mxu0  ;;  %v568_v9 = vpop.f32.mrf.mxu1 }
 0x107   :  { %v319_v24 = vadd.f32 %v543_v18, %v540_v20 }
 0x108   :  { %v545_v10 = vpop.f32.mrf.mxu0  ;;  %v569_v11 = vpop.f32.mrf.mxu1 }
 0x109   :  { %v546_v21 = vadd.f32 %v545_v10, %v544_v8  ;;  %v570_v48 = vadd.f32 %v569_v11, %v568_v9 }
 0x10a   :  { %v547_v12 = vpop.f32.mrf.mxu0  ;;  %v571_v13 = vpop.f32.mrf.mxu1 }
 0x10b   :  { %v320_v27 = vadd.f32 %v546_v21, %v319_v24 }
 0x10c   :  { %v548_v14 = vpop.f32.mrf.mxu0  ;;  %v572_v15 = vpop.f32.mrf.mxu1 }
 0x10d   :  { %v549_v25 = vadd.f32 %v548_v14, %v547_v12  ;;  %v573_v50 = vadd.f32 %v572_v15, %v571_v13 }
 0x10e   :  { %v550_v16 = vpop.f32.mrf.mxu0  ;;  %v574_v17 = vpop.f32.mrf.mxu1 }
 0x10f   :  { %v321_v31 = vadd.f32 %v549_v25, %v320_v27 }
 0x110   :  { %v551_v19 = vpop.f32.mrf.mxu0  ;;  %v575_v23 = vpop.f32.mrf.mxu1 }
 0x111   :  { %v552_v28 = vadd.f32 %v551_v19, %v550_v16  ;;  %v576_v53 = vadd.f32 %v575_v23, %v574_v17 }
 0x112   :  { %v553_v22 = vpop.f32.mrf.mxu0  ;;  %v577_v30 = vpop.f32.mrf.mxu1 }
 0x113   :  { %v322_v34 = vadd.f32 %v552_v28, %v321_v31 }
 0x114   :  { %v554_v26 = vpop.f32.mrf.mxu0  ;;  %v578_v37 = vpop.f32.mrf.mxu1 }
 0x115   :  { %v555_v32 = vadd.f32 %v554_v26, %v553_v22  ;;  %v579_v55 = vadd.f32 %v578_v37, %v577_v30 }
 0x116   :  { %v556_v29 = vpop.f32.mrf.mxu0  ;;  %v580_v42 = vpop.f32.mrf.mxu1 }
 0x117   :  { %v323_v38 = vadd.f32 %v555_v32, %v322_v34 }
 0x118   :  { %v557_v33 = vpop.f32.mrf.mxu0  ;;  %v581_v47 = vpop.f32.mrf.mxu1 }
 0x119   :  { %v558_v35 = vadd.f32 %v557_v33, %v556_v29  ;;  %v582_v59 = vadd.f32 %v581_v47, %v580_v42 }
 0x11a   :  { %v559_v36 = vpop.f32.mrf.mxu0  ;;  %v583_v52 = vpop.f32.mrf.mxu1 }
 0x11b   :  { %v324_v40 = vadd.f32 %v558_v35, %v323_v38 }
 0x11c   :  { %v560_v39 = vpop.f32.mrf.mxu0  ;;  %v584_v57 = vpop.f32.mrf.mxu1 }
 0x11d   :  { %v561_v41 = vadd.f32 %v560_v39, %v559_v36  ;;  %v585_v61 = vadd.f32 %v584_v57, %v583_v52 }
 0x11f   :  { %v325_v44 = vadd.f32 %v561_v41, %v324_v40 }
 0x121   :  { %v326_v46 = vadd.f32 %v564_v43, %v325_v44 }
 0x123   :  { %v327_v49 = vadd.f32 %v567_v45, %v326_v46 }
 0x125   :  { %v328_v51 = vadd.f32 %v570_v48, %v327_v49 }
 0x127   :  { %v329_v54 = vadd.f32 %v573_v50, %v328_v51 }
 0x129   :  { %v330_v56 = vadd.f32 %v576_v53, %v329_v54 }
 0x12b   :  { %v331_v58 = vadd.f32 %v579_v55, %v330_v56 }
 0x12d   :  { %v332_v60 = vadd.f32 %v582_v59, %v331_v58 }
 0x12f   :  { %v333_v62 = vadd.f32 %v585_v61, %v332_v60 }
 0x131   :  { %v334_v63 = vrot.slane %v333_v62, 4 }
 0x133   :  { %v335_v0 = vadd.f32 %v334_v63, %v333_v62 }
 0x135   :  { %v336_v1 = vrot.slane %v335_v0, 2 }
 0x137   :  { %v337_v2 = vadd.f32 %v336_v1, %v335_v0 }
 0x139   :  { %v338_v3 = vrot.slane %v337_v2, 1 }
 0x13b   :  { %v339_v4 = vadd.f32 %v338_v3, %v337_v2  ;;  %v520_v2 = vld [vmem:[%s748_s2] ss:$0 sm:$0xff] }
 0x13d   :  { %v341_v5 = vmul.f32 0.0078125, %v339_v4 }
 0x13f   :  { %v342_v6 = vsub.f32 %v540_v20, %v341_v5  ;;  %v343_v7 = vsub.f32 %v543_v18, %v341_v5  ;;  %v344_v8 = vsub.f32 %v546_v21, %v341_v5  ;;  %v345_v11 = vsub.f32 %v549_v25, %v341_v5 }
 0x140   :  { %v346_v12 = vsub.f32 %v552_v28, %v341_v5  ;;  %v347_v15 = vsub.f32 %v555_v32, %v341_v5  ;;  %v348_v19 = vsub.f32 %v558_v35, %v341_v5  ;;  %v349_v24 = vsub.f32 %v561_v41, %v341_v5 }
 0x141   :  { %v358_v9 = vmul.f32 %v342_v6, %v342_v6  ;;  %v359_v10 = vmul.f32 %v343_v7, %v343_v7  ;;  %v360_v13 = vmul.f32 %v344_v8, %v344_v8  ;;  %v361_v16 = vmul.f32 %v345_v11, %v345_v11 }
 0x142   :  { %v362_v22 = vmul.f32 %v346_v12, %v346_v12  ;;  %v363_v26 = vmul.f32 %v347_v15, %v347_v15  ;;  %v350_v29 = vsub.f32 %v564_v43, %v341_v5  ;;  %v364_v30 = vmul.f32 %v348_v19, %v348_v19 }
 0x143   :  { %v374_v14 = vadd.f32 %v359_v10, %v358_v9  ;;  %v351_v18 = vsub.f32 %v567_v45, %v341_v5  ;;  %v365_v21 = vmul.f32 %v349_v24, %v349_v24  ;;  %v352_v33 = vsub.f32 %v570_v48, %v341_v5 }
 0x144   :  { %v366_v25 = vmul.f32 %v350_v29, %v350_v29  ;;  %v353_v34 = vsub.f32 %v573_v50, %v341_v5  ;;  %v354_v37 = vsub.f32 %v576_v53, %v341_v5  ;;  %v355_v39 = vsub.f32 %v579_v55, %v341_v5 }
 0x145   :  { %v375_v17 = vadd.f32 %v374_v14, %v360_v13  ;;  %v367_v36 = vmul.f32 %v351_v18, %v351_v18  ;;  %v368_v38 = vmul.f32 %v352_v33, %v352_v33  ;;  %v356_v42 = vsub.f32 %v582_v59, %v341_v5 }
 0x146   :  { %v369_v40 = vmul.f32 %v353_v34, %v353_v34  ;;  %v370_v44 = vmul.f32 %v354_v37, %v354_v37  ;;  %v357_v46 = vsub.f32 %v585_v61, %v341_v5  ;;  %v371_v47 = vmul.f32 %v355_v39, %v355_v39 }
 0x147   :  { %v376_v23 = vadd.f32 %v375_v17, %v361_v16  ;;  %v372_v49 = vmul.f32 %v356_v42, %v356_v42 }
 0x148   :  { %v373_v48 = vmul.f32 %v357_v46, %v357_v46 }
 0x149   :  { %v377_v27 = vadd.f32 %v376_v23, %v362_v22 }
 0x14b   :  { %v378_v20 = vadd.f32 %v377_v27, %v363_v26  ;;  %v521_v27 = vld [vmem:[%s748_s2 + $0x1] ss:$0 sm:$0xff]  ;;  %s701_s2 = smov [#allocation7]  }
 0x14c   :  { %s491_s28 = sshll.u32 %s701_s2, 4  ;;  %s736_s28 = int_to_ptr.vmem [resolvable:$true] %s491_s28 }
 0x14d   :  { %v379_v31 = vadd.f32 %v378_v20, %v364_v30  ;;  %s669_s29 = scalar_lea.vmem %s736_s28, 2048  ;;  %p674_p11 = scmp.lt.s32.totalorder %s736_s28, %s736_s28 }
 0x14e   :  { %p670_p10 = scmp.ne.s32.totalorder %s736_s28, %s669_s29  ;;  %p675_p12 = scmp.lt.s32.totalorder %s669_s29, %s669_s29 }
 0x14f   :  { %v380_v28 = vadd.f32 %v379_v31, %v365_v21 }
 0x150   :  { %p676_p13 = por %p675_p12, %p674_p11 }
 0x151   :  { %v381_v32 = vadd.f32 %v380_v28, %v366_v25 }
 0x152   :  { %p677_p0 = pnand %p676_p13, %p670_p10 }
 0x153   :  { %v382_v35 = vadd.f32 %v381_v32, %v367_v36 }
 0x155   :  { %v383_v41 = vadd.f32 %v382_v35, %v368_v38 }
 0x157   :  { %v384_v43 = vadd.f32 %v383_v41, %v369_v40 }
 0x159   :  { %v385_v45 = vadd.f32 %v384_v43, %v370_v44 }
 0x15b   :  { %v386_v51 = vadd.f32 %v385_v45, %v371_v47 }
 0x15d   :  { %v387_v52 = vadd.f32 %v386_v51, %v372_v49 }
 0x15f   :  { %v388_v54 = vadd.f32 %v387_v52, %v373_v48 }
 0x161   :  { %v389_v50 = vrot.slane %v388_v54, 4 }
 0x163   :  { %v390_v56 = vadd.f32 %v389_v50, %v388_v54 }
 0x165   :  { %v391_v57 = vrot.slane %v390_v56, 2 }
 0x167   :  { %v392_v53 = vadd.f32 %v391_v57, %v390_v56 }
 0x169   :  { %v393_v58 = vrot.slane %v392_v53, 1 }
 0x16b   :  { %v394_v60 = vadd.f32 %v393_v58, %v392_v53 }
 0x16d   :  { %v395_v55 = vmul.f32 0.0078125, %v394_v60 }
 0x16f   :  { %v396_v62 = vadd.f32 1e-05, %v395_v55 }
 0x171   :  { %627 = vrsqrt.f32 %v396_v62 }
 0x17e   :  { %v628_v59 = vpop.eup %627 }
 0x17f   :  { %v398_v63 = vmul.f32 %v628_v59, %v342_v6  ;;  %v399_v0 = vmul.f32 %v628_v59, %v343_v7  ;;  %v400_v61 = vmul.f32 %v628_v59, %v344_v8  ;;  %v401_v1 = vmul.f32 %v628_v59, %v345_v11 }
 0x180   :  { %v402_v3 = vmul.f32 %v628_v59, %v346_v12  ;;  %v403_v4 = vmul.f32 %v628_v59, %v347_v15  ;;  %v404_v5 = vmul.f32 %v628_v59, %v348_v19  ;;  %v405_v9 = vmul.f32 %v628_v59, %v349_v24 }
 0x181   :  { %v406_v10 = vmul.f32 %v628_v59, %v350_v29  ;;  %v407_v13 = vmul.f32 %v628_v59, %v351_v18  ;;  %v408_v14 = vmul.f32 %v628_v59, %v352_v33  ;;  %v409_v16 = vmul.f32 %v628_v59, %v353_v34 }
 0x182   :  { %v410_v17 = vmul.f32 %v628_v59, %v354_v37  ;;  %v411_v22 = vmul.f32 %v628_v59, %v355_v39  ;;  %v412_v23 = vmul.f32 %v628_v59, %v356_v42  ;;  %v413_v26 = vmul.f32 %v628_v59, %v357_v46 }
 0x183   :  { %v418_v6 = vmul.f32 %v520_v2, %v398_v63  ;;  %v419_v7 = vmul.f32 %v520_v2, %v399_v0  ;;  %v420_v8 = vmul.f32 %v520_v2, %v400_v61  ;;  %v421_v11 = vmul.f32 %v520_v2, %v401_v1 }
 0x184   :  { %v422_v12 = vmul.f32 %v520_v2, %v402_v3  ;;  %v423_v15 = vmul.f32 %v520_v2, %v403_v4  ;;  %v424_v19 = vmul.f32 %v520_v2, %v404_v5  ;;  %v425_v24 = vmul.f32 %v520_v2, %v405_v9 }
 0x185   :  { %v426_v29 = vmul.f32 %v520_v2, %v406_v10  ;;  %v427_v30 = vmul.f32 %v520_v2, %v407_v13  ;;  %v428_v20 = vmul.f32 %v520_v2, %v408_v14  ;;  %v429_v18 = vmul.f32 %v520_v2, %v409_v16 }
 0x186   :  { %v430_v21 = vmul.f32 %v520_v2, %v410_v17  ;;  %v431_v31 = vmul.f32 %v520_v2, %v411_v22  ;;  %v432_v33 = vmul.f32 %v520_v2, %v412_v23  ;;  %v433_v25 = vmul.f32 %v520_v2, %v413_v26 }
 0x187   :  { %v438_v28 = vadd.f32 %v521_v27, %v418_v6  ;;  %v439_v34 = vadd.f32 %v521_v27, %v419_v7  ;;  %v440_v36 = vadd.f32 %v521_v27, %v420_v8  ;;  %v441_v32 = vadd.f32 %v521_v27, %v421_v11 }
 0x188   :  { %v442_v37 = vadd.f32 %v521_v27, %v422_v12  ;;  %v443_v38 = vadd.f32 %v521_v27, %v423_v15  ;;  %v444_v35 = vadd.f32 %v521_v27, %v424_v19  ;;  %v445_v39 = vadd.f32 %v521_v27, %v425_v24 }
 0x189   :  { %v446_v40 = vadd.f32 %v521_v27, %v426_v29  ;;  %v447_v41 = vadd.f32 %v521_v27, %v427_v30  ;;  %v448_v42 = vadd.f32 %v521_v27, %v428_v20  ;;  %v449_v44 = vadd.f32 %v521_v27, %v429_v18 }
 0x18a   :  { %v450_v43 = vadd.f32 %v521_v27, %v430_v21  ;;  %v451_v46 = vadd.f32 %v521_v27, %v431_v31  ;;  %v452_v47 = vadd.f32 %v521_v27, %v432_v33  ;;  %v453_v45 = vadd.f32 %v521_v27, %v433_v25 }
 0x18b   :  { %v454_v49 = vmax.f32 %v438_v28, 0.0  ;;  %v455_v51 = vmax.f32 %v439_v34, 0.0  ;;  %v456_v48 = vmax.f32 %v440_v36, 0.0  ;;  %v457_v52 = vmax.f32 %v441_v32, 0.0 }
 0x18c   :  { %v458_v54 = vmax.f32 %v442_v37, 0.0  ;;  %v459_v50 = vmax.f32 %v443_v38, 0.0  ;;  %v460_v56 = vmax.f32 %v444_v35, 0.0  ;;  %v461_v57 = vmax.f32 %v445_v39, 0.0 }
 0x18d   :  { %v462_v53 = vmax.f32 %v446_v40, 0.0  ;;  %v463_v58 = vmax.f32 %v447_v41, 0.0  ;;  %v464_v60 = vmax.f32 %v448_v42, 0.0  ;;  %v465_v55 = vmax.f32 %v449_v44, 0.0  ;;  %470 = vst [vmem:[#allocation7] sm:$0xff] %v454_v49  ;;  %471 = vst [vmem:[#allocation7 + $0x8] sm:$0xff] %v455_v51 }
 0x18e   :  { %472 = vst [vmem:[#allocation7 + $0x10] sm:$0xff] %v456_v48  ;;  %473 = vst [vmem:[#allocation7 + $0x18] sm:$0xff] %v457_v52  ;;  %v466_v62 = vmax.f32 %v450_v43, 0.0  ;;  %v467_v59 = vmax.f32 %v451_v46, 0.0  ;;  %v468_v63 = vmax.f32 %v452_v47, 0.0  ;;  %v469_v0 = vmax.f32 %v453_v45, 0.0 }
 0x18f   :  { %474 = vst [vmem:[#allocation7 + $0x20] sm:$0xff] %v458_v54  ;;  %475 = vst [vmem:[#allocation7 + $0x28] sm:$0xff] %v459_v50 }
 0x190   :  { %476 = vst [vmem:[#allocation7 + $0x30] sm:$0xff] %v460_v56  ;;  %477 = vst [vmem:[#allocation7 + $0x38] sm:$0xff] %v461_v57 }
 0x191   :  { %478 = vst [vmem:[#allocation7 + $0x40] sm:$0xff] %v462_v53  ;;  %479 = vst [vmem:[#allocation7 + $0x48] sm:$0xff] %v463_v58 }
 0x192   :  { %480 = vst [vmem:[#allocation7 + $0x50] sm:$0xff] %v464_v60  ;;  %481 = vst [vmem:[#allocation7 + $0x58] sm:$0xff] %v465_v55 }
 0x193   :  { %482 = vst [vmem:[#allocation7 + $0x60] sm:$0xff] %v466_v62  ;;  %483 = vst [vmem:[#allocation7 + $0x68] sm:$0xff] %v467_v59 }
 0x194   :  { %484 = vst [vmem:[#allocation7 + $0x70] sm:$0xff] %v468_v63  ;;  %485 = vst [vmem:[#allocation7 + $0x78] sm:$0xff] %v469_v0 }
 0x195   :  { %680 = shalt.err (!%p677_p0)
}
 0x196   :  { %s702_s30 = smov 128   ;;  %s703_s4 = smov 8  }
 0x197   :  { %497 = dma.vmem_to_hbm [thread:$0]  %s736_s28, 2048, %s749_s3, [#allocation4], %s702_s30, %s702_s30, %s703_s4  }
 0x198   :  { %693 = dma.done.wait [#allocation4], 2048  }
 0x199   :  { %694 = vsyncadd [#allocation4], 4294965248 }
 0x19a   :  { %501 = vsyncpa [#allocation3], 1 }
 0x19b   :  { %502 = vsyncpa [#allocation6], 1 }
 0x19c   :  { %503 = vsyncpa [#allocation4], 1 }

</bundles_post_ra>
